<compile_context>
chip_gen: v7x
topology: tpu7x:2x2x1
jax: 0.10.0
libtpu: 0.0.40
codegen_flags: <defaults>
</compile_context>

<pallas_src>
import functools

import jax
import jax.numpy as jnp
from jax.experimental import pallas as pl
from jax.experimental.pallas import tpu as pltpu


# --------------------------------- kernels ----------------------------------


def _conv1x1_kernel(x_ref, w_ref, b_ref, o_ref):
    # x_ref: (C, T), w_ref: (O, C), b_ref: (O, 1), o_ref: (O, T)
    acc = jnp.dot(w_ref[...], x_ref[...], preferred_element_type=jnp.float32)
    o_ref[...] = (acc + b_ref[...]).astype(o_ref.dtype)


def _conv1x1_ksplit_kernel(x_ref, w_ref, b_ref, o_ref, acc_ref, *, k_axis):
    # Same matmul, but C is split across grid axis `k_axis`; accumulate in f32.
    k = pl.program_id(k_axis)

    @pl.when(k == 0)
    def _():
        acc_ref[...] = jnp.zeros_like(acc_ref)

    acc_ref[...] += jnp.dot(
        w_ref[...], x_ref[...], preferred_element_type=jnp.float32
    )

    @pl.when(k == pl.num_programs(k_axis) - 1)
    def _():
        o_ref[...] = (acc_ref[...] + b_ref[...]).astype(o_ref.dtype)


# ------------------------------- tiling logic --------------------------------


def _round_up(a, m):
    return ((a + m - 1) // m) * m


def _cdiv(a, b):
    return (a + b - 1) // b


def _choose_c_block(c, itemsize, target_bytes, min_lanes):
    """Largest multiple of 128 dividing C that keeps a >= min_lanes lane tile
    within the byte budget; full C if that already fits (or C % 128 != 0)."""
    if c % 128 != 0 or c * min_lanes * itemsize <= target_bytes:
        return c
    cap = max(128, (target_bytes // (min_lanes * itemsize)) // 128 * 128)
    if cap >= c:
        return c
    best = 128
    m = 128
    while m <= min(cap, c):
        if c % m == 0:
            best = m
        m += 128
    return best


def _choose_tile(n, c_block, itemsize, target_bytes, min_lanes, min_tiles):
    """Byte-budgeted lane tile (multiple of 128, or the full axis) + grid size,
    balanced so padding waste stays < 128 lanes per tile."""
    cap = (target_bytes // max(c_block * itemsize, 1)) // 128 * 128
    cap = max(cap, 128, min(min_lanes, _round_up(n, 128)))
    num_tiles = _cdiv(n, cap)
    if n >= min_tiles * min_lanes:
        num_tiles = max(num_tiles, min_tiles)
    if num_tiles <= 1:
        return n, 1  # single full-extent block (legal even if n % 128 != 0)
    tile = _round_up(_cdiv(n, num_tiles), 128)
    return tile, _cdiv(n, tile)


def _vmem_limit_bytes(c_block, tile_n, o, in_itemsize, out_itemsize, grid_k):
    x_tile = c_block * tile_n * in_itemsize
    out_tile = o * tile_n * out_itemsize
    w_tile = o * c_block * in_itemsize
    acc = o * tile_n * 4 if grid_k > 1 else 0
    # double-buffered inputs/outputs + accumulator + headroom, generation-safe cap
    needed = 2 * (x_tile + out_tile + w_tile + 4 * o) + acc
    return int(min(max(needed * 2, 32 << 20), 64 << 20))


# --------------------------------- wrapper -----------------------------------


@functools.partial(
    jax.jit,
    static_argnames=(
        "target_x_tile_bytes",
        "min_tile_lanes",
        "fold_batch_max_l",
        "c_block",
    ),
)
def proposal_net_forward(
    x,
    weight,
    bias,
    *,
    target_x_tile_bytes=4 << 20,  # ~4 MiB of x per grid step (2-8 MiB sweet spot)
    min_tile_lanes=512,
    fold_batch_max_l=512,
    c_block=None,
):
    """x: (B, C, L), weight: (O, C), bias: (O,) -> cls_logits: (B, O, L)."""
    B, C, L = x.shape
    O = weight.shape[0]
    itemsize = jnp.dtype(x.dtype).itemsize
    out_itemsize = itemsize

    if c_block is None:
        c_block = _choose_c_block(C, itemsize, target_x_tile_bytes, min_tile_lanes)
    assert c_block == C or (c_block % 128 == 0 and C % c_block == 0), (
        "c_block must equal C or be a multiple of 128 dividing C"
    )
    grid_k = C // c_block

    bias2d = bias.reshape(O, 1)
    total_n = B * L
    cost = pl.CostEstimate(
        flops=2 * O * C * total_n,
        transcendentals=0,
        bytes_accessed=(C * total_n + O * C + O) * itemsize
        + O * total_n * out_itemsize,
    )

    fold_batch = L < fold_batch_max_l

    if fold_batch:
        # Tiny-L path: fold batch into the lane axis (one big matmul instead of
        # B lane-starved ones).  The transpose is cheap only because L is tiny.
        N = B * L
        x2d = jnp.transpose(x, (1, 0, 2)).reshape(C, N)
        tile_n, grid_n = _choose_tile(
            N, c_block, itemsize, target_x_tile_bytes, min_tile_lanes, min_tiles=2
        )
        if grid_k == 1:
            kernel = _conv1x1_kernel
            grid = (grid_n,)
            in_specs = [
                pl.BlockSpec((c_block, tile_n), lambda n: (0, n)),
                pl.BlockSpec((O, c_block), lambda n: (0, 0)),
                pl.BlockSpec((O, 1), lambda n: (0, 0)),
            ]
            out_specs = pl.BlockSpec((O, tile_n), lambda n: (0, n))
            scratch = []
            semantics = ("parallel",)
        else:
            kernel = functools.partial(_conv1x1_ksplit_kernel, k_axis=1)
            grid = (grid_n, grid_k)
            in_specs = [
                pl.BlockSpec((c_block, tile_n), lambda n, k: (k, n)),
                pl.BlockSpec((O, c_block), lambda n, k: (0, k)),
                pl.BlockSpec((O, 1), lambda n, k: (0, 0)),
            ]
            out_specs = pl.BlockSpec((O, tile_n), lambda n, k: (0, n))
            scratch = [pltpu.VMEM((O, tile_n), jnp.float32)]
            semantics = ("parallel", "arbitrary")

        out_flat = pl.pallas_call(
            kernel,
            out_shape=jax.ShapeDtypeStruct((O, N), x.dtype),
            grid_spec=pltpu.PrefetchScalarGridSpec(
                num_scalar_prefetch=0,
                grid=grid,
                in_specs=in_specs,
                out_specs=out_specs,
                scratch_shapes=scratch,
            ),
            compiler_params=pltpu.CompilerParams(
                dimension_semantics=semantics,
                vmem_limit_bytes=_vmem_limit_bytes(
                    c_block, tile_n, O, itemsize, out_itemsize, grid_k
                ),
            ),
            cost_estimate=cost,
        )(x2d, weight, bias2d)
        return jnp.transpose(out_flat.reshape(O, B, L), (1, 0, 2))

    # Native-layout path: no HBM transposes; grid over (batch, L-tiles[, C-tiles]).
    min_tiles = 1 if B >= 2 else 2  # keep >=2 parallel steps for megacore sharding
    tile_l, grid_l = _choose_tile(
        L, c_block, itemsize, target_x_tile_bytes, min_tile_lanes, min_tiles
    )

    if grid_k == 1:
        kernel = _conv1x1_kernel
        grid = (B, grid_l)
        in_specs = [
            pl.BlockSpec((None, c_block, tile_l), lambda b, l: (b, 0, l)),
            pl.BlockSpec((O, c_block), lambda b, l: (0, 0)),
            pl.BlockSpec((O, 1), lambda b, l: (0, 0)),
        ]
        out_specs = pl.BlockSpec((None, O, tile_l), lambda b, l: (b, 0, l))
        scratch = []
        semantics = ("parallel", "parallel")
    else:
        kernel = functools.partial(_conv1x1_ksplit_kernel, k_axis=2)
        grid = (B, grid_l, grid_k)
        in_specs = [
            pl.BlockSpec((None, c_block, tile_l), lambda b, l, k: (b, k, l)),
            pl.BlockSpec((O, c_block), lambda b, l, k: (0, k)),
            pl.BlockSpec((O, 1), lambda b, l, k: (0, 0)),
        ]
        out_specs = pl.BlockSpec((None, O, tile_l), lambda b, l, k: (b, 0, l))
        scratch = [pltpu.VMEM((O, tile_l), jnp.float32)]
        semantics = ("parallel", "parallel", "arbitrary")

    return pl.pallas_call(
        kernel,
        out_shape=jax.ShapeDtypeStruct((B, O, L), x.dtype),
        grid_spec=pltpu.PrefetchScalarGridSpec(
            num_scalar_prefetch=0,
            grid=grid,
            in_specs=in_specs,
            out_specs=out_specs,
            scratch_shapes=scratch,
        ),
        compiler_params=pltpu.CompilerParams(
            dimension_semantics=semantics,
            vmem_limit_bytes=_vmem_limit_bytes(
                c_block, tile_l, O, itemsize, out_itemsize, grid_k
            ),
        ),
        cost_estimate=cost,
    )(x, weight, bias2d)


# ------------------------------- param init ----------------------------------


def init_proposal_net_params(key, in_channels, num_anchors):
    """Deterministic init mimicking nn.Conv1d(in_channels, num_anchors*2, 1)."""
    out_channels = num_anchors * 2
    k_w, k_b = jax.random.split(key)
    fan_in = in_channels * 1  # kernel_size = 1
    bound = 1.0 / jnp.sqrt(jnp.float32(fan_in))
    weight = jax.random.uniform(
        k_w, (out_channels, in_channels), jnp.float32, -bound, bound
    )
    bias = jax.random.uniform(k_b, (out_channels,), jnp.float32, -bound, bound)
    return weight, bias


# ----------------------------------- main -------------------------------------


if __name__ == "__main__":
    key = jax.random.PRNGKey(0)

    # (name, B, C, L, num_anchors, extra kwargs) — small shapes, each path covered.
    cases = [
        ("fold_small_L", 2, 32, 128, 4, {}),
        ("native_single_tile", 2, 32, 640, 4, {}),
        ("native_multi_tile_edge", 2, 32, 1600, 4, {"target_x_tile_bytes": 64 << 10}),
        ("native_c_split", 2, 256, 640, 4, {"c_block": 128}),
    ]

    for idx, (name, B, C, L, num_anchors, kw) in enumerate(cases):
        k_x, k_p = jax.random.split(jax.random.fold_in(key, idx))
        x = jax.random.normal(k_x, (B, C, L), jnp.float32)
        weight, bias = init_proposal_net_params(k_p, C, num_anchors)

        cls_logits = proposal_net_forward(x, weight, bias, **kw)
        cls_logits = jax.block_until_ready(cls_logits)

        ref = (
            jnp.einsum("oc,bcl->bol", weight, x, precision=jax.lax.Precision.HIGHEST)
            + bias[None, :, None]
        )
        assert cls_logits.shape == (B, num_anchors * 2, L), name
        assert jnp.allclose(cls_logits, ref, atol=1e-4, rtol=1e-4), name

    print("KERNEL_OK")
</pallas_src>

<mosaic_0001>
module attributes {stable_mosaic.version = 11 : i64} {
  func.func @_conv1x1_kernel(%arg0: i32, %arg1: memref<32x256xf32, #tpu.memory_space<vmem>>, %arg2: memref<8x32xf32, #tpu.memory_space<vmem>>, %arg3: memref<8x1xf32, #tpu.memory_space<vmem>>, %arg4: memref<8x256xf32, #tpu.memory_space<vmem>>) attributes {dimension_semantics = [#tpu.dimension_semantics<parallel>], iteration_bounds = array<i64: 1>, scalar_prefetch = 0 : i64, scratch_operands = 0 : i64, tpu.core_type = #tpu.core_type<tc>, window_params = [{transform_indices = @transform_0, window_bounds = array<i64: 32, 256>}, {pipeline_mode = #tpu.pipeline_mode<synchronous>, transform_indices = @transform_1, window_bounds = array<i64: 8, 32>}, {pipeline_mode = #tpu.pipeline_mode<synchronous>, transform_indices = @transform_2, window_bounds = array<i64: 8, 1>}, {transform_indices = @transform_3, window_bounds = array<i64: 8, 256>}]} {
    %c0 = arith.constant 0 : index
    %c0_0 = arith.constant 0 : index
    %0 = vector.load %arg2[%c0, %c0_0] : memref<8x32xf32, #tpu.memory_space<vmem>>, vector<8x32xf32>
    %c0_1 = arith.constant 0 : index
    %c0_2 = arith.constant 0 : index
    %1 = vector.load %arg1[%c0_1, %c0_2] : memref<32x256xf32, #tpu.memory_space<vmem>>, vector<32x256xf32>
    %cst = arith.constant dense<0.000000e+00> : vector<8x256xf32>
    %2 = tpu.matmul %0, %1, %cst {dimension_numbers = #tpu.dot_dimension_numbers<[1], [0], [0], [1], [0, 0, 1, 1], [], []>} : vector<8x32xf32>, vector<32x256xf32>, vector<8x256xf32> -> vector<8x256xf32>
    %c0_3 = arith.constant 0 : index
    %c0_4 = arith.constant 0 : index
    %3 = vector.load %arg3[%c0_3, %c0_4] : memref<8x1xf32, #tpu.memory_space<vmem>>, vector<8x1xf32>
    %4 = vector.broadcast %3 : vector<8x1xf32> to vector<8x256xf32>
    %5 = arith.addf %2, %4 : vector<8x256xf32>
    %c0_5 = arith.constant 0 : index
    %c0_6 = arith.constant 0 : index
    %6 = vector.load %arg4[%c0_5, %c0_6] : memref<8x256xf32, #tpu.memory_space<vmem>>, vector<8x256xf32>
    tpu.vector_store %arg4[%c0_5, %c0_6], %5 {strides = array<i32>} : memref<8x256xf32, #tpu.memory_space<vmem>>, vector<8x256xf32>,
    return
  }
  func.func @transform_0(%arg0: i32) -> (i32, i32) {
    %c0_i32 = arith.constant 0 : i32
    %c0_i32_0 = arith.constant 0 : i32
    return %c0_i32, %arg0 : i32, i32
  }
  func.func @transform_1(%arg0: i32) -> (i32, i32) {
    %c0_i32 = arith.constant 0 : i32
    %c0_i32_0 = arith.constant 0 : i32
    %c0_i32_1 = arith.constant 0 : i32
    return %c0_i32, %c0_i32_0 : i32, i32
  }
  func.func @transform_2(%arg0: i32) -> (i32, i32) {
    %c0_i32 = arith.constant 0 : i32
    %c0_i32_0 = arith.constant 0 : i32
    %c0_i32_1 = arith.constant 0 : i32
    return %c0_i32, %c0_i32_0 : i32, i32
  }
  func.func @transform_3(%arg0: i32) -> (i32, i32) {
    %c0_i32 = arith.constant 0 : i32
    %c0_i32_0 = arith.constant 0 : i32
    return %c0_i32, %arg0 : i32, i32
  }
}

</mosaic_0001>

<bundles_post_ra>
// kernel: proposal_net_forward.1
= control target key start
LH: loop header
LB: loop body
LE: loop exit
PB: predicated region body
PF: predicated region fallthrough
CT: control target
= control target key end

     0   :  { %v158_v7 = vmov 0.0   ;;  %v159_v8 = vmov 0   ;;  %s223_s0 = inlined_call_operand.vmem [shape: f32[32,256], index: 0, kind: input, shape index: {}]   ;;  %s224_s1 = inlined_call_operand.vmem [shape: f32[8,32], index: 1, kind: input, shape index: {}]   ;;  %s225_s2 = inlined_call_operand.vmem [shape: f32[8,1], index: 2, kind: input, shape index: {}]   ;;  %s226_s3 = inlined_call_operand.hbm [shape: f32[8,256], index: 3, kind: output, shape index: {}]  }
   0x1   :  { %v17_v0 = vld [vmem:[%s223_s0 + $0x8] sm:$0xff]  ;;  %v19_v1 = vld [vmem:[%s223_s0 + $0x18] sm:$0xff]  ;;  %v16_v2 = vld [vmem:[%s223_s0] sm:$0xff]  ;;  %98 = vmatprep.mubr.f32.mxu0 %v158_v7  ;;  %133 = vset.pattern.permute.xlu0 %v159_v8 }
   0x2   :  { %v122_v3 = vpack.c.bf16 %v19_v1, %v17_v0  ;;  %v18_v4 = vld [vmem:[%s223_s0 + $0x10] sm:$0xff]  ;;  %v21_v5 = vld [vmem:[%s223_s0 + $0x28] sm:$0xff]  ;;  %v23_v6 = vld [vmem:[%s223_s0 + $0x38] sm:$0xff] }
   0x3   :  { %v124_v9 = vpack.c.bf16 %v18_v4, %v16_v2  ;;  %v126_v10 = vpack.c.bf16 %v23_v6, %v21_v5  ;;  %v20_v11 = vld [vmem:[%s223_s0 + $0x20] sm:$0xff]  ;;  %v22_v12 = vld [vmem:[%s223_s0 + $0x30] sm:$0xff] }
   0x4   :  { %123 = vmatprep.subr.bf16.mxu0 %v122_v3  ;;  %v24_v13 = vld [vmem:[%s225_s2] sm:$0xff] }
   0x5   :  { %8 = vsyncpa [#allocation3], 0  ;;  %125 = vmatpush1.bf16.msra.mxu0 %v124_v9  ;;  %v128_v14 = vpack.c.bf16 %v22_v12, %v20_v11  ;;  %27 = vperm.xlu0 %133, %v24_v13   ;;  %v15_v15 = vld [vmem:[%s224_s1] sm:$0xff]  ;;  %vm30_vm0 = vcmask 261120   ;;  %s160_s5 = smov [#allocation2]  }
   0x6   :  { %127 = vmatprep.subr.bf16.mxu0 %v126_v10  ;;  %s113_s0 = sshll.u32 %s160_s5, 4  ;;  %s114_s0 = int_to_ptr.vmem [resolvable:$true] %s113_s0 }
   0x7   :  { %s134_s2 = scalar_lea.vmem %s114_s0, 256  ;;  %p139_p1 = scmp.lt.s32.totalorder %s114_s0, %s114_s0 }
   0x8   :  { %p135_p0 = scmp.ne.s32.totalorder %s114_s0, %s134_s2  ;;  %p140_p2 = scmp.lt.s32.totalorder %s134_s2, %s134_s2 }
   0x9   :  { %129 = vmatpush1.bf16.msra.mxu0 %v128_v14 }
   0xa   :  { %p141_p3 = por %p140_p2, %p139_p1 }
   0xc   :  { %121 = vmatmul.mubr.msk.f32.vlgmr.msra.gmra.mrb[0].mxu0 %vm30_vm0, %v15_v15  ;;  %p142_p4 = pnand %p141_p3, %p135_p0 }
  0x84   :  { %v28_v16 = vpop.permute.xlu0 %27 }
  0xdf   :  { %v100_v17 = vpop.f32.mrb[0].mxu0 }
  0xe0   :  { %v101_v18 = vadd.f32 %v100_v17, %v28_v16  ;;  %v102_v19 = vpop.f32.mrb[1].mxu0 }
  0xe1   :  { %v103_v20 = vadd.f32 %v102_v19, %v28_v16 }
  0xe2   :  { %105 = vst [vmem:[#allocation2] sm:$0xff] %v101_v18 }
  0xe3   :  { %106 = vst [vmem:[#allocation2 + $0x8] sm:$0xff] %v103_v20 }
  0xe4   :  { %145 = shalt.err (!%p142_p4)
}
  0xe5   :  { %s146_s7 = scalar_lea.hbm %s226_s3, 256 }
  0xe6   :  { %p147_p5 = scmp.ne.s32.totalorder %s226_s3, %s146_s7  ;;  %p150_p6 = scmp.lt.u32.totalorder %s146_s7, %s226_s3 }
  0xe8   :  { %p152_p7 = pnand %p150_p6, %p147_p5 }
  0xea   :  { %155 = shalt.err (!%p152_p7)
}
  0xeb   :  { %116 = dma.vmem_to_hbm [thread:$0]  %s114_s0, 256, %s226_s3, [#allocation3]  }
  0xec   :  { %156 = dma.done.wait [#allocation3], 256  }
  0xed   :  { %157 = vsyncadd [#allocation3], 4294967040 }
  0xee   :  { %120 = vsyncpa [#allocation3], 1 }

</bundles_post_ra>
